<compile_context>
chip_gen: v5e
topology: v5e:2x2
jax: 0.10.0
libtpu: 0.0.40
codegen_flags: <defaults>
</compile_context>

<pallas_src>
import jax
import jax.numpy as jnp
from jax.experimental import pallas as pl
from jax.experimental.pallas import tpu as pltpu


def _round_up(x, m):
    return ((x + m - 1) // m) * m


def _mlm_kernel(x_ref, w1_ref, b1_ref, g_ref, beta_ref, w2_ref, b2_ref,
                o_ref, h_ref):
    # x_ref:   (TM, F)  bf16   masked-token features (row tile)
    # w1_ref:  (F, H)   bf16   resident across the whole grid
    # b1/g/beta: (1, H) f32    resident
    # w2_ref:  (H, TV)  bf16   streamed per vocab tile
    # b2_ref:  (1, TV)  f32    streamed per vocab tile
    # o_ref:   (TM, TV) f32    logits tile
    # h_ref:   (TM, H)  bf16   VMEM scratch (hidden after LN), persists across
    #                          the vocab-tile loop for the current row tile.

    @pl.when(pl.program_id(1) == 0)
    def _compute_hidden():
        x = x_ref[...]
        # Linear 1 (MXU), f32 accumulation, f32 bias.
        h = jnp.dot(x, w1_ref[...], preferred_element_type=jnp.float32)
        h = h + b1_ref[...]
        # ReLU (VPU).
        h = jnp.maximum(h, 0.0)
        # LayerNorm over last dim in f32 (eps = 1e-5, torch default).
        mean = jnp.mean(h, axis=-1, keepdims=True)
        centered = h - mean
        var = jnp.mean(centered * centered, axis=-1, keepdims=True)
        inv = jax.lax.rsqrt(var + 1e-5)
        h = centered * inv * g_ref[...] + beta_ref[...]
        # Stash bf16 hidden for the vocab-projection matmuls.
        h_ref[...] = h.astype(h_ref.dtype)

    # Vocab projection for this (row tile, vocab tile): pure MXU + DMA stream.
    logits = jnp.dot(h_ref[...], w2_ref[...],
                     preferred_element_type=jnp.float32) + b2_ref[...]
    o_ref[...] = logits.astype(o_ref.dtype)


def mask_lm_forward(X, pred_position, params, *, tm=256, tv=2048,
                    vmem_limit_bytes=48 * 1024 * 1024):
    """X: (B, S, F) float32; pred_position: (B, P) int32.
    Returns (B, P, vocab_size) float32 logits."""
    B, S, F = X.shape
    P = pred_position.shape[-1]
    w1, b1, gamma, beta, w2, b2 = params
    H = w1.shape[1]
    V = w2.shape[1]
    N = B * P

    # --- gather glue (matches torch fancy-index semantics) ---
    # TODO(synk): at production shapes, fuse this gather into the kernel via
    # PrefetchScalarGridSpec row indices (b*S + pos) to skip the (B*P, F) HBM
    # round trip; for small B*P it is noise.
    pred_flat = pred_position.reshape(-1)                          # (B*P,)
    batch_idx = jnp.repeat(jnp.arange(B, dtype=jnp.int32), P)      # (B*P,)
    masked_X = X[batch_idx, pred_flat]                             # (B*P, F)

    # --- tile sizes & padding (last-two block dims (8,128)-aligned or full) ---
    n_pad = _round_up(N, 8)
    TM = min(tm, n_pad)
    n_pad = _round_up(n_pad, TM)

    v_pad = _round_up(V, 128)
    TV = min(tv, v_pad)
    v_pad = _round_up(v_pad, TV)

    if n_pad != N:
        masked_X = jnp.pad(masked_X, ((0, n_pad - N), (0, 0)))
    if v_pad != V:
        w2 = jnp.pad(w2, ((0, 0), (0, v_pad - V)))
        b2 = jnp.pad(b2, ((0, v_pad - V),))

    # bf16 matmul operands; biases / LayerNorm affine stay f32.
    x_bf = masked_X.astype(jnp.bfloat16)
    w1_bf = w1.astype(jnp.bfloat16)
    w2_bf = w2.astype(jnp.bfloat16)
    b1_2d = b1.reshape(1, H).astype(jnp.float32)
    g_2d = gamma.reshape(1, H).astype(jnp.float32)
    beta_2d = beta.reshape(1, H).astype(jnp.float32)
    b2_2d = b2.reshape(1, v_pad).astype(jnp.float32)

    grid = (n_pad // TM, v_pad // TV)

    cost = pl.CostEstimate(
        flops=2 * N * (F * H + H * V),
        transcendentals=N,
        bytes_accessed=(x_bf.size + w1_bf.size + w2_bf.size) * 2
        + n_pad * v_pad * 4,
    )

    out = pl.pallas_call(
        _mlm_kernel,
        out_shape=jax.ShapeDtypeStruct((n_pad, v_pad), jnp.float32),
        grid=grid,
        in_specs=[
            pl.BlockSpec((TM, F), lambda i, v: (i, 0)),    # x row tile
            pl.BlockSpec((F, H), lambda i, v: (0, 0)),     # w1 (resident)
            pl.BlockSpec((1, H), lambda i, v: (0, 0)),     # b1
            pl.BlockSpec((1, H), lambda i, v: (0, 0)),     # gamma
            pl.BlockSpec((1, H), lambda i, v: (0, 0)),     # beta
            pl.BlockSpec((H, TV), lambda i, v: (0, v)),    # w2 vocab tile
            pl.BlockSpec((1, TV), lambda i, v: (0, v)),    # b2 vocab tile
        ],
        out_specs=pl.BlockSpec((TM, TV), lambda i, v: (i, v)),
        scratch_shapes=[pltpu.VMEM((TM, H), jnp.bfloat16)],
        compiler_params=pltpu.CompilerParams(
            dimension_semantics=("parallel", "arbitrary"),
            vmem_limit_bytes=vmem_limit_bytes),
        cost_estimate=cost,
    )(x_bf, w1_bf, b1_2d, g_2d, beta_2d, w2_bf, b2_2d)

    return out[:N, :V].reshape(B, P, V)


def init_params(key, mlm_in_features, mlm_hiddens, vocab_size):
    k1, k2 = jax.random.split(key)
    w1 = jax.random.normal(k1, (mlm_in_features, mlm_hiddens),
                           jnp.float32) * 0.02
    b1 = jnp.zeros((mlm_hiddens,), jnp.float32)
    gamma = jnp.ones((mlm_hiddens,), jnp.float32)
    beta = jnp.zeros((mlm_hiddens,), jnp.float32)
    w2 = jax.random.normal(k2, (mlm_hiddens, vocab_size),
                           jnp.float32) * 0.02
    b2 = jnp.zeros((vocab_size,), jnp.float32)
    return (w1, b1, gamma, beta, w2, b2)


def _reference(X, pred_position, params):
    """Pure-JAX f32 reference for sanity check."""
    B, S, F = X.shape
    P = pred_position.shape[-1]
    pred_flat = pred_position.reshape(-1)
    batch_idx = jnp.repeat(jnp.arange(B, dtype=jnp.int32), P)
    mX = X[batch_idx, pred_flat]
    w1, b1, gamma, beta, w2, b2 = params
    h = jnp.maximum(mX @ w1 + b1, 0.0)
    mean = h.mean(-1, keepdims=True)
    var = ((h - mean) ** 2).mean(-1, keepdims=True)
    h = (h - mean) / jnp.sqrt(var + 1e-5) * gamma + beta
    return (h @ w2 + b2).reshape(B, P, -1)


if __name__ == "__main__":
    key = jax.random.PRNGKey(0)
    kx, kp, kparam = jax.random.split(key, 3)

    batch, seq, in_features = 2, 16, 32
    mlm_hiddens, vocab_size = 128, 256
    num_pred = 4

    X = jax.random.normal(kx, (batch, seq, in_features), jnp.float32)
    pred_position = jax.random.randint(kp, (batch, num_pred), 0, seq,
                                       dtype=jnp.int32)
    params = init_params(kparam, in_features, mlm_hiddens, vocab_size)

    y = mask_lm_forward(X, pred_position, params)
    y = jax.block_until_ready(y)

    y_ref = _reference(X, pred_position, params)
    assert y.shape == (batch, num_pred, vocab_size)
    # bf16 matmul operands (f32 accumulation) -> loosened tolerance.
    assert jnp.allclose(y, y_ref, atol=3e-2, rtol=3e-2)

    print("KERNEL_OK")
</pallas_src>

<mosaic_0001>
module attributes {stable_mosaic.version = 11 : i64} {
  func.func @_mlm_kernel(%arg0: i32, %arg1: i32, %arg2: memref<8x32xbf16, #tpu.memory_space<vmem>>, %arg3: memref<32x128xbf16, #tpu.memory_space<vmem>>, %arg4: memref<1x128xf32, #tpu.memory_space<vmem>>, %arg5: memref<1x128xf32, #tpu.memory_space<vmem>>, %arg6: memref<1x128xf32, #tpu.memory_space<vmem>>, %arg7: memref<128x256xbf16, #tpu.memory_space<vmem>>, %arg8: memref<1x256xf32, #tpu.memory_space<vmem>>, %arg9: memref<8x256xf32, #tpu.memory_space<vmem>>, %arg10: memref<8x128xbf16, #tpu.memory_space<vmem>>) attributes {dimension_semantics = [#tpu.dimension_semantics<parallel>, #tpu.dimension_semantics<arbitrary>], iteration_bounds = array<i64: 1, 1>, scalar_prefetch = 0 : i64, scratch_operands = 1 : i64, tpu.core_type = #tpu.core_type<tc>, window_params = [{transform_indices = @transform_0, window_bounds = array<i64: 8, 32>}, {pipeline_mode = #tpu.pipeline_mode<synchronous>, transform_indices = @transform_1, window_bounds = array<i64: 32, 128>}, {pipeline_mode = #tpu.pipeline_mode<synchronous>, transform_indices = @transform_2, window_bounds = array<i64: 1, 128>}, {pipeline_mode = #tpu.pipeline_mode<synchronous>, transform_indices = @transform_3, window_bounds = array<i64: 1, 128>}, {pipeline_mode = #tpu.pipeline_mode<synchronous>, transform_indices = @transform_4, window_bounds = array<i64: 1, 128>}, {transform_indices = @transform_5, window_bounds = array<i64: 128, 256>}, {transform_indices = @transform_6, window_bounds = array<i64: 1, 256>}, {transform_indices = @transform_7, window_bounds = array<i64: 8, 256>}]} {
    %c0_i32 = arith.constant 0 : i32
    %0 = arith.cmpi eq, %arg1, %c0_i32 : i32
    %1 = arith.extui %0 : i1 to i32
    %c0_i32_0 = arith.constant 0 : i32
    %2 = arith.cmpi ne, %1, %c0_i32_0 : i32
    scf.if %2 {
      %c0_8 = arith.constant 0 : index
      %c0_9 = arith.constant 0 : index
      %10 = vector.load %arg2[%c0_8, %c0_9] : memref<8x32xbf16, #tpu.memory_space<vmem>>, vector<8x32xbf16>
      %c0_10 = arith.constant 0 : index
      %c0_11 = arith.constant 0 : index
      %11 = vector.load %arg3[%c0_10, %c0_11] : memref<32x128xbf16, #tpu.memory_space<vmem>>, vector<32x128xbf16>
      %cst_12 = arith.constant dense<0.000000e+00> : vector<8x128xf32>
      %12 = tpu.matmul %10, %11, %cst_12 {dimension_numbers = #tpu.dot_dimension_numbers<[1], [0], [0], [1], [0, 0, 1, 1], [], []>} : vector<8x32xbf16>, vector<32x128xbf16>, vector<8x128xf32> -> vector<8x128xf32>
      %c0_13 = arith.constant 0 : index
      %c0_14 = arith.constant 0 : index
      %13 = vector.load %arg4[%c0_13, %c0_14] : memref<1x128xf32, #tpu.memory_space<vmem>>, vector<1x128xf32>
      %14 = vector.broadcast %13 : vector<1x128xf32> to vector<8x128xf32>
      %15 = arith.addf %12, %14 : vector<8x128xf32>
      %cst_15 = arith.constant 0.000000e+00 : f32
      %16 = vector.broadcast %cst_15 : f32 to vector<8x128xf32>
      %17 = arith.maximumf %15, %16 : vector<8x128xf32>
      %cst_16 = arith.constant dense<0.000000e+00> : vector<8xf32>
      %18 = vector.multi_reduction <add>, %17, %cst_16 [1] : vector<8x128xf32> to vector<8xf32>
      %19 = vector.shape_cast %18 : vector<8xf32> to vector<8x1xf32>
      %cst_17 = arith.constant 1.280000e+02 : f32
      %20 = vector.broadcast %cst_17 : f32 to vector<8x1xf32>
      %21 = arith.divf %19, %20 : vector<8x1xf32>
      %22 = vector.broadcast %21 : vector<8x1xf32> to vector<8x128xf32>
      %23 = arith.subf %17, %22 : vector<8x128xf32>
      %24 = arith.mulf %23, %23 : vector<8x128xf32>
      %cst_18 = arith.constant dense<0.000000e+00> : vector<8xf32>
      %25 = vector.multi_reduction <add>, %24, %cst_18 [1] : vector<8x128xf32> to vector<8xf32>
      %26 = vector.shape_cast %25 : vector<8xf32> to vector<8x1xf32>
      %cst_19 = arith.constant 1.280000e+02 : f32
      %27 = vector.broadcast %cst_19 : f32 to vector<8x1xf32>
      %28 = arith.divf %26, %27 : vector<8x1xf32>
      %cst_20 = arith.constant 9.99999974E-6 : f32
      %29 = vector.broadcast %cst_20 : f32 to vector<8x1xf32>
      %30 = arith.addf %28, %29 : vector<8x1xf32>
      %31 = math.rsqrt %30 : vector<8x1xf32>
      %32 = vector.broadcast %31 : vector<8x1xf32> to vector<8x128xf32>
      %33 = arith.mulf %23, %32 : vector<8x128xf32>
      %c0_21 = arith.constant 0 : index
      %c0_22 = arith.constant 0 : index
      %34 = vector.load %arg5[%c0_21, %c0_22] : memref<1x128xf32, #tpu.memory_space<vmem>>, vector<1x128xf32>
      %35 = vector.broadcast %34 : vector<1x128xf32> to vector<8x128xf32>
      %36 = arith.mulf %33, %35 : vector<8x128xf32>
      %c0_23 = arith.constant 0 : index
      %c0_24 = arith.constant 0 : index
      %37 = vector.load %arg6[%c0_23, %c0_24] : memref<1x128xf32, #tpu.memory_space<vmem>>, vector<1x128xf32>
      %38 = vector.broadcast %37 : vector<1x128xf32> to vector<8x128xf32>
      %39 = arith.addf %36, %38 : vector<8x128xf32>
      %40 = arith.truncf %39 : vector<8x128xf32> to vector<8x128xbf16>
      %c0_25 = arith.constant 0 : index
      %c0_26 = arith.constant 0 : index
      %41 = vector.load %arg10[%c0_25, %c0_26] : memref<8x128xbf16, #tpu.memory_space<vmem>>, vector<8x128xbf16>
      tpu.vector_store %arg10[%c0_25, %c0_26], %40 {strides = array<i32>} : memref<8x128xbf16, #tpu.memory_space<vmem>>, vector<8x128xbf16>,
    } else {
    }
    %c0 = arith.constant 0 : index
    %c0_1 = arith.constant 0 : index
    %3 = vector.load %arg10[%c0, %c0_1] : memref<8x128xbf16, #tpu.memory_space<vmem>>, vector<8x128xbf16>
    %c0_2 = arith.constant 0 : index
    %c0_3 = arith.constant 0 : index
    %4 = vector.load %arg7[%c0_2, %c0_3] : memref<128x256xbf16, #tpu.memory_space<vmem>>, vector<128x256xbf16>
    %cst = arith.constant dense<0.000000e+00> : vector<8x256xf32>
    %5 = tpu.matmul %3, %4, %cst {dimension_numbers = #tpu.dot_dimension_numbers<[1], [0], [0], [1], [0, 0, 1, 1], [], []>} : vector<8x128xbf16>, vector<128x256xbf16>, vector<8x256xf32> -> vector<8x256xf32>
    %c0_4 = arith.constant 0 : index
    %c0_5 = arith.constant 0 : index
    %6 = vector.load %arg8[%c0_4, %c0_5] : memref<1x256xf32, #tpu.memory_space<vmem>>, vector<1x256xf32>
    %7 = vector.broadcast %6 : vector<1x256xf32> to vector<8x256xf32>
    %8 = arith.addf %5, %7 : vector<8x256xf32>
    %c0_6 = arith.constant 0 : index
    %c0_7 = arith.constant 0 : index
    %9 = vector.load %arg9[%c0_6, %c0_7] : memref<8x256xf32, #tpu.memory_space<vmem>>, vector<8x256xf32>
    tpu.vector_store %arg9[%c0_6, %c0_7], %8 {strides = array<i32>} : memref<8x256xf32, #tpu.memory_space<vmem>>, vector<8x256xf32>,
    return
  }
  func.func @transform_0(%arg0: i32, %arg1: i32) -> (i32, i32) {
    %c0_i32 = arith.constant 0 : i32
    %c0_i32_0 = arith.constant 0 : i32
    return %arg0, %c0_i32 : i32, i32
  }
  func.func @transform_1(%arg0: i32, %arg1: i32) -> (i32, i32) {
    %c0_i32 = arith.constant 0 : i32
    %c0_i32_0 = arith.constant 0 : i32
    %c0_i32_1 = arith.constant 0 : i32
    return %c0_i32, %c0_i32_0 : i32, i32
  }
  func.func @transform_2(%arg0: i32, %arg1: i32) -> (i32, i32) {
    %c0_i32 = arith.constant 0 : i32
    %c0_i32_0 = arith.constant 0 : i32
    %c0_i32_1 = arith.constant 0 : i32
    return %c0_i32, %c0_i32_0 : i32, i32
  }
  func.func @transform_3(%arg0: i32, %arg1: i32) -> (i32, i32) {
    %c0_i32 = arith.constant 0 : i32
    %c0_i32_0 = arith.constant 0 : i32
    %c0_i32_1 = arith.constant 0 : i32
    return %c0_i32, %c0_i32_0 : i32, i32
  }
  func.func @transform_4(%arg0: i32, %arg1: i32) -> (i32, i32) {
    %c0_i32 = arith.constant 0 : i32
    %c0_i32_0 = arith.constant 0 : i32
    %c0_i32_1 = arith.constant 0 : i32
    return %c0_i32, %c0_i32_0 : i32, i32
  }
  func.func @transform_5(%arg0: i32, %arg1: i32) -> (i32, i32) {
    %c0_i32 = arith.constant 0 : i32
    %c0_i32_0 = arith.constant 0 : i32
    return %c0_i32, %arg1 : i32, i32
  }
  func.func @transform_6(%arg0: i32, %arg1: i32) -> (i32, i32) {
    %c0_i32 = arith.constant 0 : i32
    %c0_i32_0 = arith.constant 0 : i32
    return %c0_i32, %arg1 : i32, i32
  }
  func.func @transform_7(%arg0: i32, %arg1: i32) -> (i32, i32) {
    %c0_i32 = arith.constant 0 : i32
    return %arg0, %arg1 : i32, i32
  }
}

</mosaic_0001>

<bundles_post_ra>
// kernel: tpu_custom_call.1
= control target key start
LH: loop header
LB: loop body
LE: loop exit
PB: predicated region body
PF: predicated region fallthrough
CT: control target
= control target key end

     0   :  { %12 = vsyncpa [#allocation4], 0  ;;  %s677_s0 = inlined_call_operand.hbm [shape: bf16[8,32], index: 0, kind: input, shape index: {}]   ;;  %s678_s1 = inlined_call_operand.hbm [shape: bf16[32,128], index: 1, kind: input, shape index: {}]   ;;  %s679_s2 = inlined_call_operand.vmem [shape: f32[1,128], index: 2, kind: input, shape index: {}]   ;;  %s680_s3 = inlined_call_operand.hbm [shape: f32[1,128], index: 3, kind: input, shape index: {}]   ;;  %s681_s4 = inlined_call_operand.hbm [shape: f32[1,128], index: 4, kind: input, shape index: {}]   ;;  %s682_s5 = inlined_call_operand.hbm [shape: bf16[128,256], index: 5, kind: input, shape index: {}]   ;;  %s683_s6 = inlined_call_operand.vmem [shape: f32[1,256], index: 6, kind: input, shape index: {}]   ;;  %s684_s7 = inlined_call_operand.hbm [shape: f32[8,256], index: 7, kind: output, shape index: {}]  }
   0x1   :  { %13 = vsyncpa [#allocation7], 0 }
   0x2   :  { %14 = vsyncpa [#allocation10], 0  ;;  %s31_s26 = sshll.u32 %s678_s1, 4  ;;  %s32_s26 = int_to_ptr.hbm [resolvable:$true] %s31_s26 }
   0x3   :  { %15 = vsyncpa [#allocation5], 0  ;;  %s593_s27 = smov [#allocation6]   ;;  %s58_s8 = sshll.u32 %s681_s4, 4  ;;  %s59_s8 = int_to_ptr.hbm [resolvable:$true] %s58_s8 }
   0x4   :  { %s33_s28 = sshll.u32 %s593_s27, 4  ;;  %s594_s9 = smov 64   ;;  %s34_s28 = int_to_ptr.vmem [resolvable:$true] %s33_s28 }
   0x5   :  { %s595_s10 = smov 4   ;;  %s596_s11 = smov [#allocation9]  }
   0x6   :  { %39 = dma.hbm_to_vmem [thread:$0]  %s32_s26, 256, %s34_s28, [#allocation7], %s594_s9, %s594_s9, %s595_s10  }
   0x7   :  { %s60_s12 = sshll.u32 %s596_s11, 4  ;;  %s21_s15 = sshll.u32 %s677_s0, 4  ;;  %s61_s12 = int_to_ptr.vmem [resolvable:$true] %s60_s12  ;;  %s22_s15 = int_to_ptr.hbm [resolvable:$true] %s21_s15 }
   0x8   :  { %63 = dma.hbm_to_vmem [thread:$0]  %s59_s8, 16, %s61_s12, [#allocation10]  }
   0x9   :  { %s47_s17 = sshll.u32 %s680_s3, 4  ;;  %s597_s18 = smov [#allocation3]   ;;  %s48_s17 = int_to_ptr.hbm [resolvable:$true] %s47_s17 }
   0xa   :  { %s23_s19 = sshll.u32 %s597_s18, 4  ;;  %s598_s4 = smov [#allocation8]   ;;  %s24_s19 = int_to_ptr.vmem [resolvable:$true] %s23_s19 }
   0xb   :  { %26 = dma.hbm_to_vmem [thread:$0]  %s22_s15, 64, %s24_s19, [#allocation4]  }
   0xc   :  { %s49_s20 = sshll.u32 %s598_s4, 4  ;;  %s68_s23 = sshll.u32 %s682_s5, 4  ;;  %s50_s20 = int_to_ptr.vmem [resolvable:$true] %s49_s20  ;;  %s69_s23 = int_to_ptr.hbm [resolvable:$true] %s68_s23 }
   0xd   :  { %52 = dma.hbm_to_vmem [thread:$0]  %s48_s17, 16, %s50_s20, [#allocation7]  }
   0xe   :  { %s599_s0 = smov [#allocation11]   ;;  %s600_s25 = smov 128  }
   0xf   :  { %s70_s24 = sshll.u32 %s599_s0, 4  ;;  %s601_s26 = smov 8   ;;  %s71_s24 = int_to_ptr.vmem [resolvable:$true] %s70_s24 }
  0x10   :  { %76 = dma.hbm_to_vmem [thread:$0]  %s69_s23, 2048, %s71_s24, [#allocation10], %s600_s25, %s600_s25, %s601_s26  }
  0x11   :  { %585 = dma.done.wait [#allocation4], 64  }
  0x12   :  { %586 = vsyncadd [#allocation4], 4294967232 }
  0x13   :  { %587 = dma.done.wait [#allocation7], 272  }
  0x14   :  { %588 = vsyncadd [#allocation7], 4294967024 }
  0x15   :  { %589 = dma.done.wait [#allocation10], 2064  }
  0x16   :  { %590 = vsyncadd [#allocation10], 4294965232  ;;  %v406_v0 = vld [vmem:[#allocation6 + $0x8] sm:$0xff]  ;;  %v405_v1 = vld [vmem:[#allocation6] sm:$0xff]  ;;  %vm125_vm0 = vcmask 261120   ;;  %v602_v8 = vmov 128.0  }
  0x17   :  { %135 = vmatpush.bf16.msra.mxu0 %v406_v0  ;;  %v104_v2 = vld [vmem:[#allocation3] sm:$0xf]  ;;  %v434_v3 = vld [vmem:[%s679_s2] ss:$0 sm:$0xff]  ;;  %437 = vrcp.f32 %v602_v8  ;;  %v399_v19 = vld [vmem:[#allocation11 + $0x70] sm:$0xf] }
  0x18   :  { %v422_v20 = vld [vmem:[#allocation11 + $0x74] sm:$0xf0]  ;;  %v421_v21 = vld [vmem:[#allocation11 + $0x74] sm:$0xf]  ;;  %v401_v23 = vld [vmem:[#allocation11 + $0x78] sm:$0xf0] }
  0x19   :  { %v400_v22 = vor.u32 %v422_v20, %v399_v19  ;;  %v404_v24 = vor.u32 %v421_v21, %v401_v23  ;;  %v391_v25 = vld [vmem:[#allocation11 + $0x60] sm:$0xf]  ;;  %v420_v26 = vld [vmem:[#allocation11 + $0x64] sm:$0xf0]  ;;  %v419_v27 = vld [vmem:[#allocation11 + $0x64] sm:$0xf] }
  0x1a   :  { %v392_v28 = vor.u32 %v420_v26, %v391_v25  ;;  %v393_v29 = vld [vmem:[#allocation11 + $0x68] sm:$0xf0]  ;;  %v383_v31 = vld [vmem:[#allocation11 + $0x50] sm:$0xf]  ;;  %v418_v32 = vld [vmem:[#allocation11 + $0x54] sm:$0xf0] }
  0x1b   :  { %136 = vmatpush.bf16.msra.mxu0 %v405_v1  ;;  %285 = vmatpush.bf16.msra.mxu1 %v400_v22  ;;  %v396_v30 = vor.u32 %v419_v27, %v393_v29  ;;  %v417_v33 = vld [vmem:[#allocation11 + $0x54] sm:$0xf]  ;;  %v384_v34 = vor.u32 %v418_v32, %v383_v31  ;;  %v385_v35 = vld [vmem:[#allocation11 + $0x58] sm:$0xf0]  ;;  %v375_v37 = vld [vmem:[#allocation11 + $0x40] sm:$0xf] }
  0x1c   :  { %298 = vmatpush.bf16.msra.mxu2 %v404_v24  ;;  %v388_v36 = vor.u32 %v417_v33, %v385_v35  ;;  %v416_v38 = vld [vmem:[#allocation11 + $0x44] sm:$0xf0]  ;;  %v415_v39 = vld [vmem:[#allocation11 + $0x44] sm:$0xf]  ;;  %v377_v41 = vld [vmem:[#allocation11 + $0x48] sm:$0xf0] }
  0x1d   :  { %v438_v9 = vpop.eup %437  ;;  %v376_v40 = vor.u32 %v416_v38, %v375_v37  ;;  %v380_v42 = vor.u32 %v415_v39, %v377_v41  ;;  %v367_v43 = vld [vmem:[#allocation11 + $0x30] sm:$0xf]  ;;  %v414_v44 = vld [vmem:[#allocation11 + $0x34] sm:$0xf0]  ;;  %v413_v45 = vld [vmem:[#allocation11 + $0x34] sm:$0xf] }
  0x1e   :  { %340 = vmatmul.msk.bf16.vlgmr.msra.gmra.mxu0 %vm125_vm0, %v104_v2  ;;  %v146_v10 = vmul.f32 128.0, %v438_v9  ;;  %vm150_vm1 = vweird.f32 %v438_v9  ;;  %v368_v46 = vor.u32 %v414_v44, %v367_v43  ;;  %v369_v47 = vld [vmem:[#allocation11 + $0x38] sm:$0xf0]  ;;  %v359_v49 = vld [vmem:[#allocation11 + $0x20] sm:$0xf]  ;;  %s603_s28 = smov [#allocation12]  }
  0x1f   :  { %286 = vmatpush.bf16.msra.mxu1 %v392_v28  ;;  %v372_v48 = vor.u32 %v413_v45, %v369_v47  ;;  %v412_v50 = vld [vmem:[#allocation11 + $0x24] sm:$0xf0]  ;;  %v411_v51 = vld [vmem:[#allocation11 + $0x24] sm:$0xf]  ;;  %v361_v53 = vld [vmem:[#allocation11 + $0x28] sm:$0xf0] }
  0x20   :  { %v147_v11 = vsub.f32 1.0, %v146_v10  ;;  %299 = vmatpush.bf16.msra.mxu2 %v396_v30  ;;  %v360_v52 = vor.u32 %v412_v50, %v359_v49  ;;  %v364_v54 = vor.u32 %v411_v51, %v361_v53  ;;  %v351_v55 = vld [vmem:[#allocation11 + $0x10] sm:$0xf]  ;;  %v410_v56 = vld [vmem:[#allocation11 + $0x14] sm:$0xf0]  ;;  %s318_s29 = sshll.u32 %s603_s28, 4  ;;  %s319_s29 = int_to_ptr.vmem [resolvable:$true] %s318_s29 }
  0x21   :  { %v409_v57 = vld [vmem:[#allocation11 + $0x14] sm:$0xf]  ;;  %v352_v58 = vor.u32 %v410_v56, %v351_v55  ;;  %v353_v59 = vld [vmem:[#allocation11 + $0x18] sm:$0xf0]  ;;  %v343_v61 = vld [vmem:[#allocation11] sm:$0xf] }
  0x22   :  { %v148_v12 = vmul.f32 %v438_v9, %v147_v11  ;;  %v356_v60 = vor.u32 %v409_v57, %v353_v59  ;;  %v408_v62 = vld [vmem:[#allocation11 + $0x4] sm:$0xf0]  ;;  %v407_v63 = vld [vmem:[#allocation11 + $0x4] sm:$0xf]  ;;  %v345_v2 = vld [vmem:[#allocation11 + $0x8] sm:$0xf0] }
  0x23   :  { %287 = vmatpush.bf16.msra.mxu1 %v384_v34  ;;  %v344_v1 = vor.u32 %v408_v62, %v343_v61  ;;  %v199_v21 = vld [vmem:[%s683_s6] sm:$0x3]  ;;  %s320_s9 = sshll.u32 %s684_s7, 4  ;;  %s321_s9 = int_to_ptr.hbm [resolvable:$true] %s320_s9 }
  0x24   :  { %v149_v13 = vadd.f32 %v438_v9, %v148_v12  ;;  %300 = vmatpush.bf16.msra.mxu2 %v388_v36  ;;  %v435_v12 = vld [vmem:[#allocation8] ss:$0 sm:$0xff]  ;;  %v201_v22 = vperm.slane %v199_v21, 0  ;;  %v202_v25 = vperm.slane %v199_v21, 1 }
  0x26   :  { %v662_v14 = vsel %vm150_vm1, %v438_v9, %v149_v13 }
  0x27   :  { %288 = vmatpush.bf16.msra.mxu1 %v376_v40 }
  0x28   :  { %301 = vmatpush.bf16.msra.mxu2 %v380_v42 }
  0x2b   :  { %289 = vmatpush.bf16.msra.mxu1 %v368_v46 }
  0x2c   :  { %302 = vmatpush.bf16.msra.mxu2 %v372_v48 }
  0x2f   :  { %290 = vmatpush.bf16.msra.mxu1 %v360_v52 }
  0x30   :  { %303 = vmatpush.bf16.msra.mxu2 %v364_v54 }
  0x33   :  { %291 = vmatpush.bf16.msra.mxu1 %v352_v58 }
  0x34   :  { %304 = vmatpush.bf16.msra.mxu2 %v356_v60 }
  0x37   :  { %292 = vmatpush.bf16.msra.mxu1 %v344_v1 }
  0x9b   :  { %v138_v4 = vpop.f32.mrf.mxu0 }
  0x9c   :  { %v139_v5 = vadd.f32 %v434_v3, %v138_v4  ;;  %v348_v4 = vor.u32 %v407_v63, %v345_v2 }
  0x9e   :  { %v142_v6 = vmax.f32 %v139_v5, 0.0  ;;  %305 = vmatpush.bf16.msra.mxu2 %v348_v4 }
  0xa0   :  { %143 = vadd.xlane.f32.xlu0 %v142_v6 }
  0xa3   :  { %v140_v7 = vpop.f32.mrf.mxu0 }
 0x113   :  { %v144_v15 = vpop.xlane.xlu0 %143 }
 0x114   :  { %v152_v16 = vmul.f32 %v662_v14, %v144_v15  ;;  %v436_v15 = vld [vmem:[#allocation9] ss:$0 sm:$0xff] }
 0x116   :  { %v665_v17 = vsub.f32 %v142_v6, %v152_v16 }
 0x118   :  { %v154_v18 = vmul.f32 %v665_v17, %v665_v17 }
 0x11a   :  { %155 = vadd.xlane.f32.xlu0 %v154_v18 }
 0x18d   :  { %v156_v0 = vpop.xlane.xlu0 %155 }
 0x18e   :  { %v157_v3 = vmul.f32 %v156_v0, %v662_v14 }
 0x190   :  { %v158_v5 = vadd.f32 1e-05, %v157_v3 }
 0x192   :  { %439 = vrsqrt.f32 %v158_v5  ;;  %vm165_vm3 = vweird.f32 %v158_v5 }
 0x198   :  { %v440_v6 = vpop.eup %439 }
 0x199   :  { %v160_v7 = vmul.f32 %v440_v6, %v158_v5  ;;  %vm166_vm2 = vweird.f32 %v440_v6 }
 0x19a   :  { %vm167_vm4 = vmor %vm165_vm3, %vm166_vm2 }
 0x19b   :  { %v161_v8 = vmul.f32 %v440_v6, %v160_v7 }
 0x19d   :  { %v162_v9 = vmul.f32 0.5, %v161_v8 }
 0x19f   :  { %v163_v10 = vsub.f32 1.5, %v162_v9 }
 0x1a1   :  { %v164_v11 = vmul.f32 %v440_v6, %v163_v10 }
 0x1a3   :  { %v168_v13 = vsel %vm167_vm4, %v440_v6, %v164_v11 }
 0x1a4   :  { %v169_v14 = vmul.f32 %v168_v13, %v665_v17 }
 0x1a6   :  { %v174_v16 = vmul.f32 %v435_v12, %v169_v14 }
 0x1a8   :  { %v179_v18 = vadd.f32 %v436_v15, %v174_v16 }
 0x1aa   :  { %v180_v19 = vpack.c.bf16 %v179_v18, %v179_v18 }
 0x1ac   :  { %181 = vst [vmem:[#allocation2] sm:$0xf] %v180_v19 }
 0x1b3   :  { %v182_v20 = vld [vmem:[#allocation2] sm:$0xf] }
 0x1b4   :  { %293 = vmatmul.bf16.vlgmr.msra.gmra.mxu1 %v182_v20  ;;  %306 = vmatmul.bf16.vlgmr.msra.gmra.mxu2 %v182_v20 }
 0x231   :  { %v294_v23 = vpop.f32.mrf.mxu1 }
 0x232   :  { %v295_v24 = vadd.f32 %v294_v23, %v201_v22 }
 0x234   :  { %311 = vst [vmem:[#allocation12] sm:$0xff] %v295_v24 }
 0x237   :  { %v307_v17 = vpop.f32.mrf.mxu2 }
 0x238   :  { %v308_v26 = vadd.f32 %v307_v17, %v202_v25 }
 0x239   :  { %v296_v27 = vpop.f32.mrf.mxu1 }
 0x23a   :  { %312 = vst [vmem:[#allocation12 + $0x8] sm:$0xff] %v308_v26 }
 0x23b   :  { %323 = dma.vmem_to_hbm [thread:$0]  %s319_s29, 256, %s321_s9, [#allocation5]  }
 0x23f   :  { %v309_v28 = vpop.f32.mrf.mxu2 }
 0x240   :  { %591 = dma.done.wait [#allocation5], 256  }
 0x241   :  { %592 = vsyncadd [#allocation5], 4294967040 }
 0x242   :  { %328 = vsyncpa [#allocation4], 1 }
 0x243   :  { %329 = vsyncpa [#allocation7], 1 }
 0x244   :  { %330 = vsyncpa [#allocation10], 1 }
 0x245   :  { %331 = vsyncpa [#allocation5], 1 }

</bundles_post_ra>
